<compile_context>
chip_gen: v7x
topology: tpu7x:2x2x1
jax: 0.10.0
libtpu: 0.0.40
codegen_flags: <defaults>
</compile_context>

<pallas_src>
import functools

import jax
import jax.numpy as jnp
from jax.experimental import pallas as pl
from jax.experimental.pallas import tpu as pltpu

WEIGHT = 0.5   # self.weight in Type_loss.__init__ (no learnable parameters)
LANE = 128


def _type_loss_kernel(sur_ref, tgt_ref, code_ref, logits_ref, out_ref, acc_ref):
    step = pl.program_id(0)

    @pl.when(step == 0)
    def _init():
        acc_ref[...] = jnp.zeros_like(acc_ref)

    sur = sur_ref[...]                                    # (1, T) f32
    tgt = tgt_ref[...]                                    # (1, T) f32
    code = code_ref[...].astype(jnp.int32)                # (1, T) packed predicates
    logits = logits_ref[...].astype(jnp.float32)          # (3, T) f32 (.to(torch.float32))

    l0 = logits[0:1, :]
    l1 = logits[1:2, :]
    l2 = logits[2:3, :]

    # class-unrolled, max-stabilized log-softmax: pure per-lane VPU/EUP work (no XLU reduce)
    m = jnp.maximum(l0, jnp.maximum(l1, l2))
    lse = jnp.log(jnp.exp(l0 - m) + jnp.exp(l1 - m) + jnp.exp(l2 - m))

    # one-hot "gather" as selects: pick z = logit[bin] - m; target < 0 -> no bin -> CE = 0
    in0 = (tgt >= 0.0) & (tgt < 300.0)
    in1 = (tgt >= 300.0) & (tgt < 450.0)
    in2 = tgt >= 450.0
    z_sel = jnp.where(in0, l0 - m, jnp.where(in1, l1 - m, jnp.where(in2, l2 - m, lse)))
    ce = lse - z_sel                                      # (1, T) per-sample cross entropy

    # bit-code: bit0 -> pseudo==1, bit1 -> pseudo==2, bit2 -> alive==0 (padding lanes are 0)
    is_pseudo = (code & 1) > 0
    is_true = (code & 2) > 0
    alive_is_zero = (code & 4) > 0

    valid_mask = (is_true & ((sur < tgt) | alive_is_zero)).astype(jnp.float32)
    pseudo_mask = is_pseudo.astype(jnp.float32)

    # accumulate 4 lane-wise partial sums; reduce across lanes only once, at the last step
    acc_ref[0:1, :] += valid_mask * ce
    acc_ref[1:2, :] += pseudo_mask * ce
    acc_ref[2:3, :] += valid_mask
    acc_ref[3:4, :] += pseudo_mask

    @pl.when(step == pl.num_programs(0) - 1)
    def _finalize():
        s = jnp.sum(acc_ref[...], axis=1, keepdims=True)              # (4, 1)
        loss_true = s[0:1, :] / jnp.maximum(s[2:3, :], 1.0)
        loss_pseudo = s[1:2, :] / jnp.maximum(s[3:4, :], 1.0)
        out_ref[...] = loss_true + WEIGHT * loss_pseudo


def _pad_up(x, m):
    return ((x + m - 1) // m) * m


@functools.partial(jax.jit, static_argnames=("tile",))
def type_loss(inputs, target, type_logits, target_label, alive, pseudo, bins, *, tile=2048):
    # target_label / bins are unused by the PyTorch forward; kept for signature parity.
    del target_label, bins
    n = target.shape[0]

    sur = jnp.reshape(inputs, (-1,)).astype(jnp.float32)              # torch.squeeze(inputs)
    tgt = jnp.reshape(target, (-1,)).astype(jnp.float32)
    alive = jnp.reshape(alive, (-1,))
    pseudo = jnp.reshape(pseudo, (-1,))

    # pack the three integer predicates into one int8 byte per sample (cuts HBM traffic)
    code = (
        (pseudo == 1).astype(jnp.int8)
        + (pseudo == 2).astype(jnp.int8) * 2
        + (alive == 0).astype(jnp.int8) * 4
    )
    logits_t = jnp.transpose(jnp.reshape(type_logits, (n, 3)))        # (3, N), native dtype

    tile = min(tile, _pad_up(n, LANE))                                # lane-aligned tile
    n_pad = _pad_up(n, tile)
    pad = n_pad - n

    sur = jnp.pad(sur, (0, pad)).reshape(1, n_pad)
    tgt = jnp.pad(tgt, (0, pad)).reshape(1, n_pad)
    code = jnp.pad(code, (0, pad)).reshape(1, n_pad)                  # pad code=0 -> excluded
    logits_t = jnp.pad(logits_t, ((0, 0), (0, pad)))

    grid = n_pad // tile

    out = pl.pallas_call(
        _type_loss_kernel,
        out_shape=jax.ShapeDtypeStruct((1, 1), jnp.float32),
        grid_spec=pltpu.PrefetchScalarGridSpec(
            num_scalar_prefetch=0,
            grid=(grid,),
            in_specs=[
                pl.BlockSpec((1, tile), lambda i: (0, i)),            # sur
                pl.BlockSpec((1, tile), lambda i: (0, i)),            # tgt
                pl.BlockSpec((1, tile), lambda i: (0, i)),            # packed int8 flags
                pl.BlockSpec((3, tile), lambda i: (0, i)),            # logits (3, N)
            ],
            out_specs=pl.BlockSpec((1, 1), lambda i: (0, 0)),
            scratch_shapes=[pltpu.VMEM((4, tile), jnp.float32)],
        ),
        compiler_params=pltpu.CompilerParams(dimension_semantics=("arbitrary",)),
    )(sur, tgt, code, logits_t)
    return out[0, 0]


def type_loss_ref(inputs, target, type_logits, target_label, alive, pseudo, bins):
    """Pure-JAX reference mirroring the PyTorch module semantics."""
    del target_label, bins
    sur = jnp.reshape(inputs, (-1,)).astype(jnp.float32)
    tgt = jnp.reshape(target, (-1,)).astype(jnp.float32)
    logits = type_logits.astype(jnp.float32)

    bin_idx = jnp.where(tgt < 300.0, 0, jnp.where(tgt < 450.0, 1, 2))
    onehot = jax.nn.one_hot(bin_idx, 3) * (tgt >= 0.0)[:, None]
    logp = jax.nn.log_softmax(logits, axis=-1)
    ce = -jnp.sum(onehot * logp, axis=-1)

    valid = ((pseudo == 2) & ((sur < tgt) | (alive == 0))).astype(jnp.float32)
    psm = (pseudo == 1).astype(jnp.float32)
    lt = jnp.sum(valid * ce) / jnp.maximum(jnp.sum(valid), 1.0)
    lp = jnp.sum(psm * ce) / jnp.maximum(jnp.sum(psm), 1.0)
    return lt + WEIGHT * lp


if __name__ == "__main__":
    key = jax.random.PRNGKey(0)

    def make_batch(k, n):
        k1, k2, k3, k4, k5 = jax.random.split(k, 5)
        inputs = jax.random.uniform(k1, (n, 1), minval=0.0, maxval=600.0)      # predicted time
        target = jax.random.uniform(k2, (n,), minval=0.0, maxval=600.0)        # true time (days)
        logits = jax.random.normal(k3, (n, 3), dtype=jnp.float32).astype(jnp.bfloat16)
        alive = jax.random.bernoulli(k4, 0.5, (n,)).astype(jnp.int32)
        pseudo = jax.random.randint(k5, (n,), 0, 3).astype(jnp.int32)          # 0/1/2 labels
        target_label = jnp.zeros((n,), jnp.int32)                              # unused by forward
        bins = jnp.zeros((n,), jnp.int32)                                      # unused by forward
        return inputs, target, logits, target_label, alive, pseudo, bins

    k_small, k_big = jax.random.split(key)

    # small batch (grid of 1)
    args = make_batch(k_small, 8)
    loss = type_loss(*args)
    jax.block_until_ready(loss)
    ref = type_loss_ref(*args)
    assert jnp.allclose(loss, ref, atol=2e-5, rtol=1e-5), (loss, ref)

    # larger batch with a small tile to exercise the multi-step pipelined accumulation path
    args = make_batch(k_big, 300)
    loss = type_loss(*args, tile=128)
    jax.block_until_ready(loss)
    ref = type_loss_ref(*args)
    assert jnp.allclose(loss, ref, atol=2e-5, rtol=1e-5), (loss, ref)

    print("KERNEL_OK")
</pallas_src>

<mosaic_0001>
module attributes {stable_mosaic.version = 11 : i64} {
  func.func @_type_loss_kernel(%arg0: i32, %arg1: memref<1x128xf32, #tpu.memory_space<vmem>>, %arg2: memref<1x128xf32, #tpu.memory_space<vmem>>, %arg3: memref<1x128xi8, #tpu.memory_space<vmem>>, %arg4: memref<3x128xbf16, #tpu.memory_space<vmem>>, %arg5: memref<1x1xf32, #tpu.memory_space<vmem>>, %arg6: memref<4x128xf32, #tpu.memory_space<vmem>>) attributes {dimension_semantics = [#tpu.dimension_semantics<arbitrary>], iteration_bounds = array<i64: 1>, scalar_prefetch = 0 : i64, scratch_operands = 1 : i64, tpu.core_type = #tpu.core_type<tc>, window_params = [{transform_indices = @transform_0, window_bounds = array<i64: 1, 128>}, {transform_indices = @transform_1, window_bounds = array<i64: 1, 128>}, {transform_indices = @transform_2, window_bounds = array<i64: 1, 128>}, {transform_indices = @transform_3, window_bounds = array<i64: 3, 128>}, {pipeline_mode = #tpu.pipeline_mode<synchronous>, transform_indices = @transform_4, window_bounds = array<i64: 1, 1>}]} {
    %c0_i32 = arith.constant 0 : i32
    %0 = arith.cmpi eq, %arg0, %c0_i32 : i32
    %1 = arith.extui %0 : i1 to i32
    %c0_i32_0 = arith.constant 0 : i32
    %2 = arith.cmpi ne, %1, %c0_i32_0 : i32
    scf.if %2 {
      %cst_30 = arith.constant 0.000000e+00 : f32
      %78 = vector.broadcast %cst_30 : f32 to vector<4x128xf32>
      %c0_31 = arith.constant 0 : index
      %c0_32 = arith.constant 0 : index
      %79 = vector.load %arg6[%c0_31, %c0_32] : memref<4x128xf32, #tpu.memory_space<vmem>>, vector<4x128xf32>
      tpu.vector_store %arg6[%c0_31, %c0_32], %78 {strides = array<i32>} : memref<4x128xf32, #tpu.memory_space<vmem>>, vector<4x128xf32>,
    } else {
    }
    %c0 = arith.constant 0 : index
    %c0_1 = arith.constant 0 : index
    %3 = vector.load %arg1[%c0, %c0_1] : memref<1x128xf32, #tpu.memory_space<vmem>>, vector<1x128xf32>
    %c0_2 = arith.constant 0 : index
    %c0_3 = arith.constant 0 : index
    %4 = vector.load %arg2[%c0_2, %c0_3] : memref<1x128xf32, #tpu.memory_space<vmem>>, vector<1x128xf32>
    %c0_4 = arith.constant 0 : index
    %c0_5 = arith.constant 0 : index
    %5 = vector.load %arg3[%c0_4, %c0_5] : memref<1x128xi8, #tpu.memory_space<vmem>>, vector<1x128xi8>
    %6 = arith.extsi %5 : vector<1x128xi8> to vector<1x128xi32>
    %c0_6 = arith.constant 0 : index
    %c0_7 = arith.constant 0 : index
    %7 = vector.load %arg4[%c0_6, %c0_7] : memref<3x128xbf16, #tpu.memory_space<vmem>>, vector<3x128xbf16>
    %8 = arith.extf %7 : vector<3x128xbf16> to vector<3x128xf32>
    %9 = vector.extract_strided_slice %8 {offsets = [0, 0], sizes = [1, 128], strides = [1, 1]} : vector<3x128xf32> to vector<1x128xf32>
    %10 = vector.extract_strided_slice %8 {offsets = [1, 0], sizes = [1, 128], strides = [1, 1]} : vector<3x128xf32> to vector<1x128xf32>
    %11 = vector.extract_strided_slice %8 {offsets = [2, 0], sizes = [1, 128], strides = [1, 1]} : vector<3x128xf32> to vector<1x128xf32>
    %12 = arith.maximumf %10, %11 : vector<1x128xf32>
    %13 = arith.maximumf %9, %12 : vector<1x128xf32>
    %14 = arith.subf %9, %13 : vector<1x128xf32>
    %15 = math.exp %14 : vector<1x128xf32>
    %16 = arith.subf %10, %13 : vector<1x128xf32>
    %17 = math.exp %16 : vector<1x128xf32>
    %18 = arith.addf %15, %17 : vector<1x128xf32>
    %19 = arith.subf %11, %13 : vector<1x128xf32>
    %20 = math.exp %19 : vector<1x128xf32>
    %21 = arith.addf %18, %20 : vector<1x128xf32>
    %22 = math.log %21 : vector<1x128xf32>
    %cst = arith.constant 0.000000e+00 : f32
    %23 = vector.broadcast %cst : f32 to vector<1x128xf32>
    %24 = arith.cmpf oge, %4, %23 : vector<1x128xf32>
    %cst_8 = arith.constant 3.000000e+02 : f32
    %25 = vector.broadcast %cst_8 : f32 to vector<1x128xf32>
    %26 = arith.cmpf olt, %4, %25 : vector<1x128xf32>
    %27 = arith.andi %24, %26 : vector<1x128xi1>
    %cst_9 = arith.constant 3.000000e+02 : f32
    %28 = vector.broadcast %cst_9 : f32 to vector<1x128xf32>
    %29 = arith.cmpf oge, %4, %28 : vector<1x128xf32>
    %cst_10 = arith.constant 4.500000e+02 : f32
    %30 = vector.broadcast %cst_10 : f32 to vector<1x128xf32>
    %31 = arith.cmpf olt, %4, %30 : vector<1x128xf32>
    %32 = arith.andi %29, %31 : vector<1x128xi1>
    %cst_11 = arith.constant 4.500000e+02 : f32
    %33 = vector.broadcast %cst_11 : f32 to vector<1x128xf32>
    %34 = arith.cmpf oge, %4, %33 : vector<1x128xf32>
    %35 = arith.subf %9, %13 : vector<1x128xf32>
    %36 = arith.subf %10, %13 : vector<1x128xf32>
    %37 = arith.subf %11, %13 : vector<1x128xf32>
    %38 = arith.select %34, %37, %22 : vector<1x128xi1>, vector<1x128xf32>
    %39 = arith.select %32, %36, %38 : vector<1x128xi1>, vector<1x128xf32>
    %40 = arith.select %27, %35, %39 : vector<1x128xi1>, vector<1x128xf32>
    %41 = arith.subf %22, %40 : vector<1x128xf32>
    %c1_i32 = arith.constant 1 : i32
    %42 = vector.broadcast %c1_i32 : i32 to vector<1x128xi32>
    %43 = arith.andi %6, %42 : vector<1x128xi32>
    %c0_i32_12 = arith.constant 0 : i32
    %44 = vector.broadcast %c0_i32_12 : i32 to vector<1x128xi32>
    %45 = arith.cmpi sgt, %43, %44 : vector<1x128xi32>
    %c2_i32 = arith.constant 2 : i32
    %46 = vector.broadcast %c2_i32 : i32 to vector<1x128xi32>
    %47 = arith.andi %6, %46 : vector<1x128xi32>
    %c0_i32_13 = arith.constant 0 : i32
    %48 = vector.broadcast %c0_i32_13 : i32 to vector<1x128xi32>
    %49 = arith.cmpi sgt, %47, %48 : vector<1x128xi32>
    %c4_i32 = arith.constant 4 : i32
    %50 = vector.broadcast %c4_i32 : i32 to vector<1x128xi32>
    %51 = arith.andi %6, %50 : vector<1x128xi32>
    %c0_i32_14 = arith.constant 0 : i32
    %52 = vector.broadcast %c0_i32_14 : i32 to vector<1x128xi32>
    %53 = arith.cmpi sgt, %51, %52 : vector<1x128xi32>
    %54 = arith.cmpf olt, %3, %4 : vector<1x128xf32>
    %55 = arith.ori %54, %53 : vector<1x128xi1>
    %56 = arith.andi %49, %55 : vector<1x128xi1>
    %57 = arith.extui %56 : vector<1x128xi1> to vector<1x128xi32>
    %58 = arith.sitofp %57 : vector<1x128xi32> to vector<1x128xf32>
    %59 = arith.extui %45 : vector<1x128xi1> to vector<1x128xi32>
    %60 = arith.sitofp %59 : vector<1x128xi32> to vector<1x128xf32>
    %c0_15 = arith.constant 0 : index
    %c0_16 = arith.constant 0 : index
    %61 = vector.load %arg6[%c0_15, %c0_16] : memref<4x128xf32, #tpu.memory_space<vmem>>, vector<1x128xf32>
    %62 = arith.mulf %58, %41 : vector<1x128xf32>
    %63 = arith.addf %61, %62 : vector<1x128xf32>
    %c0_17 = arith.constant 0 : index
    %c0_18 = arith.constant 0 : index
    %64 = vector.load %arg6[%c0_17, %c0_18] : memref<4x128xf32, #tpu.memory_space<vmem>>, vector<1x128xf32>
    tpu.vector_store %arg6[%c0_17, %c0_18], %63 {strides = array<i32>} : memref<4x128xf32, #tpu.memory_space<vmem>>, vector<1x128xf32>,
    %c1 = arith.constant 1 : index
    %c0_19 = arith.constant 0 : index
    %65 = vector.load %arg6[%c1, %c0_19] : memref<4x128xf32, #tpu.memory_space<vmem>>, vector<1x128xf32>
    %66 = arith.mulf %60, %41 : vector<1x128xf32>
    %67 = arith.addf %65, %66 : vector<1x128xf32>
    %c1_20 = arith.constant 1 : index
    %c0_21 = arith.constant 0 : index
    %68 = vector.load %arg6[%c1_20, %c0_21] : memref<4x128xf32, #tpu.memory_space<vmem>>, vector<1x128xf32>
    tpu.vector_store %arg6[%c1_20, %c0_21], %67 {strides = array<i32>} : memref<4x128xf32, #tpu.memory_space<vmem>>, vector<1x128xf32>,
    %c2 = arith.constant 2 : index
    %c0_22 = arith.constant 0 : index
    %69 = vector.load %arg6[%c2, %c0_22] : memref<4x128xf32, #tpu.memory_space<vmem>>, vector<1x128xf32>
    %70 = arith.addf %69, %58 : vector<1x128xf32>
    %c2_23 = arith.constant 2 : index
    %c0_24 = arith.constant 0 : index
    %71 = vector.load %arg6[%c2_23, %c0_24] : memref<4x128xf32, #tpu.memory_space<vmem>>, vector<1x128xf32>
    tpu.vector_store %arg6[%c2_23, %c0_24], %70 {strides = array<i32>} : memref<4x128xf32, #tpu.memory_space<vmem>>, vector<1x128xf32>,
    %c3 = arith.constant 3 : index
    %c0_25 = arith.constant 0 : index
    %72 = vector.load %arg6[%c3, %c0_25] : memref<4x128xf32, #tpu.memory_space<vmem>>, vector<1x128xf32>
    %73 = arith.addf %72, %60 : vector<1x128xf32>
    %c3_26 = arith.constant 3 : index
    %c0_27 = arith.constant 0 : index
    %74 = vector.load %arg6[%c3_26, %c0_27] : memref<4x128xf32, #tpu.memory_space<vmem>>, vector<1x128xf32>
    tpu.vector_store %arg6[%c3_26, %c0_27], %73 {strides = array<i32>} : memref<4x128xf32, #tpu.memory_space<vmem>>, vector<1x128xf32>,
    %c0_i32_28 = arith.constant 0 : i32
    %75 = arith.cmpi eq, %arg0, %c0_i32_28 : i32
    %76 = arith.extui %75 : i1 to i32
    %c0_i32_29 = arith.constant 0 : i32
    %77 = arith.cmpi ne, %76, %c0_i32_29 : i32
    scf.if %77 {
      %c0_30 = arith.constant 0 : index
      %c0_31 = arith.constant 0 : index
      %78 = vector.load %arg6[%c0_30, %c0_31] : memref<4x128xf32, #tpu.memory_space<vmem>>, vector<4x128xf32>
      %cst_32 = arith.constant dense<0.000000e+00> : vector<4xf32>
      %79 = vector.multi_reduction <add>, %78, %cst_32 [1] : vector<4x128xf32> to vector<4xf32>
      %80 = vector.shape_cast %79 : vector<4xf32> to vector<4x1xf32>
      %81 = vector.extract_strided_slice %80 {offsets = [0, 0], sizes = [1, 1], strides = [1, 1]} : vector<4x1xf32> to vector<1x1xf32>
      %82 = vector.extract_strided_slice %80 {offsets = [2, 0], sizes = [1, 1], strides = [1, 1]} : vector<4x1xf32> to vector<1x1xf32>
      %cst_33 = arith.constant 1.000000e+00 : f32
      %83 = vector.broadcast %cst_33 : f32 to vector<1x1xf32>
      %84 = arith.maximumf %82, %83 : vector<1x1xf32>
      %85 = arith.divf %81, %84 : vector<1x1xf32>
      %86 = vector.extract_strided_slice %80 {offsets = [1, 0], sizes = [1, 1], strides = [1, 1]} : vector<4x1xf32> to vector<1x1xf32>
      %87 = vector.extract_strided_slice %80 {offsets = [3, 0], sizes = [1, 1], strides = [1, 1]} : vector<4x1xf32> to vector<1x1xf32>
      %cst_34 = arith.constant 1.000000e+00 : f32
      %88 = vector.broadcast %cst_34 : f32 to vector<1x1xf32>
      %89 = arith.maximumf %87, %88 : vector<1x1xf32>
      %90 = arith.divf %86, %89 : vector<1x1xf32>
      %cst_35 = arith.constant 5.000000e-01 : f32
      %91 = vector.broadcast %cst_35 : f32 to vector<1x1xf32>
      %92 = arith.mulf %91, %90 : vector<1x1xf32>
      %93 = arith.addf %85, %92 : vector<1x1xf32>
      %c0_36 = arith.constant 0 : index
      %c0_37 = arith.constant 0 : index
      %94 = vector.load %arg5[%c0_36, %c0_37] : memref<1x1xf32, #tpu.memory_space<vmem>>, vector<1x1xf32>
      tpu.vector_store %arg5[%c0_36, %c0_37], %93 {strides = array<i32>} : memref<1x1xf32, #tpu.memory_space<vmem>>, vector<1x1xf32>,
    } else {
    }
    return
  }
  func.func @transform_0(%arg0: i32) -> (i32, i32) {
    %c0_i32 = arith.constant 0 : i32
    %c0_i32_0 = arith.constant 0 : i32
    return %c0_i32, %arg0 : i32, i32
  }
  func.func @transform_1(%arg0: i32) -> (i32, i32) {
    %c0_i32 = arith.constant 0 : i32
    %c0_i32_0 = arith.constant 0 : i32
    return %c0_i32, %arg0 : i32, i32
  }
  func.func @transform_2(%arg0: i32) -> (i32, i32) {
    %c0_i32 = arith.constant 0 : i32
    %c0_i32_0 = arith.constant 0 : i32
    return %c0_i32, %arg0 : i32, i32
  }
  func.func @transform_3(%arg0: i32) -> (i32, i32) {
    %c0_i32 = arith.constant 0 : i32
    %c0_i32_0 = arith.constant 0 : i32
    return %c0_i32, %arg0 : i32, i32
  }
  func.func @transform_4(%arg0: i32) -> (i32, i32) {
    %c0_i32 = arith.constant 0 : i32
    %c0_i32_0 = arith.constant 0 : i32
    %c0_i32_1 = arith.constant 0 : i32
    return %c0_i32, %c0_i32_0 : i32, i32
  }
}

</mosaic_0001>

<bundles_post_ra>
// kernel: type_loss.1
= control target key start
LH: loop header
LB: loop body
LE: loop exit
PB: predicated region body
PF: predicated region fallthrough
CT: control target
= control target key end

     0   :  { %v215_v0 = vmov 0.0   ;;  %s275_s0 = inlined_call_operand.vmem [shape: f32[1,128], index: 0, kind: input, shape index: {}]   ;;  %s276_s1 = inlined_call_operand.vmem [shape: f32[1,128], index: 1, kind: input, shape index: {}]   ;;  %s277_s2 = inlined_call_operand.vmem [shape: s8[1,128], index: 2, kind: input, shape index: {}]   ;;  %s278_s3 = inlined_call_operand.vmem [shape: bf16[3,128], index: 3, kind: input, shape index: {}]   ;;  %s279_s4 = inlined_call_operand.hbm [shape: f32[1,1], index: 4, kind: output, shape index: {}]  }
   0x1   :  { %22 = vst [vmem:[#allocation2] sm:$0xf] %v215_v0  ;;  %v25_v1 = vld [vmem:[%s277_s2] sm:$0x1] }
   0x2   :  { %v27_v2 = vld [vmem:[%s278_s3] sm:$0x3]  ;;  %v26_v4 = vunpack.c.0.s8 %v25_v1 }
   0x3   :  { %v23_v3 = vld [vmem:[%s275_s0] sm:$0x1]  ;;  %v28_v5 = vunpack.c.l.bf16 %v27_v2 }
   0x4   :  { %v255_v6 = vld [vmem:[%s276_s1] sm:$0x1]  ;;  %v110_v8 = vand.u32 1, %v26_v4  ;;  %v112_v9 = vand.u32 2, %v26_v4 }
   0x5   :  { %v172_v7 = vrot.slane %v28_v5, 9 }
   0x6   :  { %9 = vsyncpa [#allocation4], 0  ;;  %v114_v10 = vand.u32 4, %v26_v4  ;;  %vm116_vm0 = vcmp.lt.f32.partialorder %v23_v3, %v255_v6  ;;  %vm111_vm1 = vcmp.gt.s32.totalorder %v110_v8, 0  ;;  %vm113_vm2 = vcmp.gt.s32.totalorder %v112_v9, 0  ;;  %s217_s0 = smov [#allocation3]  }
   0x7   :  { %v33_v11 = vmax.f32 %v28_v5, %v172_v7  ;;  %v177_v13 = vsel %vm111_vm1, 1.0, %v215_v0  ;;  %v216_v28 = vmov 1966171168   ;;  %v76_v30 = vlaneseq  ;;  %s164_s1 = sshll.u32 %s217_s0, 4  ;;  %s165_s1 = int_to_ptr.vmem [resolvable:$true] %s164_s1 }
   0x8   :  { %vm115_vm3 = vcmp.gt.s32.totalorder %v114_v10, 0  ;;  %v131_v14 = vld [vmem:[#allocation2 + $0x2] sm:$0x1]  ;;  %v134_v15 = vld [vmem:[#allocation2 + $0x3] sm:$0x1]  ;;  %v74_v29 = vunpack.c.l.s4 %v216_v28  ;;  %vm68_vm6 = vcmp.ge.f32.partialorder %v255_v6, 300.0  ;;  %p196_p1 = scmp.lt.s32.totalorder %s165_s1, %s165_s1 }
   0x9   :  { %v173_v12 = vrot.slane %v33_v11, 9  ;;  %vm117_vm4 = vmor %vm116_vm0, %vm115_vm3  ;;  %v135_v18 = vadd.f32 %v177_v13, %v134_v15  ;;  %v77_v34 = vshrl.u32 %v76_v30, 7  ;;  %vm69_vm7 = vcmp.lt.f32.partialorder %v255_v6, 450.0  ;;  %v123_v53 = vld [vmem:[#allocation2] sm:$0x1]  ;;  %s191_s2 = scalar_lea.vmem %s165_s1, 16 }
   0xa   :  { %vm118_vm5 = vmand %vm113_vm2, %vm117_vm4  ;;  %v75_v33 = vunpack.c.0.s8 %v74_v29  ;;  %vm65_vm8 = vcmp.ge.f32.partialorder %v255_v6, 0.0  ;;  %vm66_vm9 = vcmp.lt.f32.partialorder %v255_v6, 300.0  ;;  %vm71_vm10 = vcmp.ge.f32.partialorder %v255_v6, 450.0  ;;  %v127_v54 = vld [vmem:[#allocation2 + $0x1] sm:$0x1]  ;;  %p192_p0 = scmp.ne.s32.totalorder %s165_s1, %s191_s2  ;;  %s195_s3 = scalar_lea.vmem %s165_s1, 32 }
   0xb   :  { %v38_v16 = vmax.f32 %v28_v5, %v173_v12  ;;  %v176_v17 = vsel %vm118_vm5, 1.0, %v215_v0  ;;  %136 = vst [vmem:[#allocation2 + $0x3] sm:$0x1] %v135_v18  ;;  %vm70_vm11 = vmand %vm68_vm6, %vm69_vm7  ;;  %vm141_vm13 = vcmask 1043456   ;;  %vm156_vm14 = vcmask 0   ;;  %p197_p2 = scmp.lt.s32.totalorder %s195_s3, %s191_s2 }
   0xc   :  { %v132_v19 = vadd.f32 %v176_v17, %v131_v14  ;;  %v78_v39 = vsub.s32 %v75_v33, %v77_v34  ;;  %vm67_vm12 = vmand %vm65_vm8, %vm66_vm9 }
   0xd   :  { %v39_v20 = vsub.f32 %v28_v5, %v38_v16  ;;  %v43_v21 = vrot.slane %v38_v16, 7  ;;  %v53_v22 = vrot.slane %v38_v16, 6  ;;  %p198_p3 = por %p197_p2, %p196_p1 }
   0xe   :  { %133 = vst [vmem:[#allocation2 + $0x2] sm:$0x1] %v132_v19 }
   0xf   :  { %v40_v23 = vmul.f32 1.442695, %v39_v20  ;;  %v45_v24 = vsub.f32 %v28_v5, %v43_v21  ;;  %v55_v25 = vsub.f32 %v28_v5, %v53_v22  ;;  %p199_p4 = pnand %p198_p3, %p192_p0 }
  0x11   :  { %v46_v26 = vmul.f32 1.442695, %v45_v24  ;;  %v56_v27 = vmul.f32 1.442695, %v55_v25  ;;  %181 = vpow2.f32 %v40_v23  ;;  %v79_v41 = vrot.slane %v55_v25, %v78_v39 }
  0x12   :  { %v97_v42 = vrot.slane %v45_v24, %v78_v39 }
  0x13   :  { %183 = vpow2.f32 %v46_v26  ;;  %v86_v43 = vrot.slane %v79_v41, %v78_v39 }
  0x14   :  { %185 = vpow2.f32 %v56_v27  ;;  %v98_v44 = vcombine.high %v97_v42, %v97_v42 }
  0x15   :  { %v87_v45 = vcombine.high %v86_v43, %v86_v43 }
  0x16   :  { %v105_v47 = vrot.slane %v98_v44, %v78_v39 }
  0x1b   :  { %v182_v31 = vpop.eup %181 }
  0x1d   :  { %v184_v32 = vpop.eup %183 }
  0x1e   :  { %v186_v35 = vpop.eup %185  ;;  %v174_v36 = vrot.slane %v184_v32, 9 }
  0x1f   :  { %v175_v37 = vrot.slane %v186_v35, 10 }
  0x20   :  { %v52_v38 = vadd.f32 %v182_v31, %v174_v36 }
  0x22   :  { %v62_v40 = vadd.f32 %v175_v37, %v52_v38 }
  0x24   :  { %187 = vlog2.f32 %v62_v40 }
  0x2e   :  { %v188_v46 = vpop.eup %187 }
  0x2f   :  { %v64_v48 = vmul.f32 0.6931472, %v188_v46 }
  0x31   :  { %v89_v49 = vsel %vm71_vm10, %v87_v45, %v64_v48 }
  0x32   :  { %v107_v50 = vsel %vm70_vm11, %v105_v47, %v89_v49 }
  0x33   :  { %v108_v51 = vsel %vm67_vm12, %v39_v20, %v107_v50 }
  0x34   :  { %v109_v52 = vsub.f32 %v64_v48, %v108_v51 }
  0x36   :  { %v124_v55 = vmul.f32 %v176_v17, %v109_v52  ;;  %v128_v56 = vmul.f32 %v177_v13, %v109_v52 }
  0x38   :  { %v125_v57 = vadd.f32 %v124_v55, %v123_v53  ;;  %v129_v58 = vadd.f32 %v128_v56, %v127_v54 }
  0x3a   :  { %126 = vst [vmem:[#allocation2] sm:$0x1] %v125_v57  ;;  %130 = vst [vmem:[#allocation2 + $0x1] sm:$0x1] %v129_v58 }
  0x41   :  { %v140_v59 = vld [vmem:[#allocation2] sm:$0xf] }
  0x42   :  { %v142_v60 = vsel %vm141_vm13, %v140_v59, 0.0 }
  0x43   :  { %143 = vadd.xlane.f32.xlu0 %v142_v60 }
  0xd0   :  { %v144_v61 = vpop.xlane.xlu0 %143 }
  0xd1   :  { %v145_v62 = vmax.f32 %v144_v61, 1.0 }
  0xd3   :  { %v147_v63 = vrot.slane %v145_v62, 2 }
  0xd5   :  { %189 = vrcp.f32 %v147_v63 }
  0xdf   :  { %v190_v0 = vpop.eup %189 }
  0xe0   :  { %v150_v1 = vmul.f32 %v190_v0, %v144_v61 }
  0xe2   :  { %v151_v2 = vmul.f32 0.5, %v150_v1 }
  0xe4   :  { %v153_v3 = vrot.slane %v151_v2, 1 }
  0xe6   :  { %v155_v4 = vadd.f32 %v153_v3, %v150_v1 }
  0xe8   :  { %157 = vst.msk [vmem:[#allocation3] sm:$0x1] %vm156_vm14, %v155_v4 }
  0xe9   :  { %202 = shalt.err (!%p199_p4)
}
  0xea   :  { %s203_s25 = scalar_lea.hbm %s279_s4, 16 }
  0xeb   :  { %p204_p5 = scmp.ne.s32.totalorder %s279_s4, %s203_s25  ;;  %p207_p6 = scmp.lt.u32.totalorder %s203_s25, %s279_s4 }
  0xed   :  { %p209_p7 = pnand %p207_p6, %p204_p5 }
  0xef   :  { %212 = shalt.err (!%p209_p7)
}
  0xf0   :  { %167 = dma.vmem_to_hbm [thread:$0]  %s165_s1, 16, %s279_s4, [#allocation4]  }
  0xf1   :  { %213 = dma.done.wait [#allocation4], 16  }
  0xf2   :  { %214 = vsyncadd [#allocation4], 4294967280 }
  0xf3   :  { %171 = vsyncpa [#allocation4], 1 }

</bundles_post_ra>
